<compile_context>
chip_gen: v5e
topology: v5e:2x2
jax: 0.10.0
libtpu: 0.0.40
codegen_flags: <defaults>
</compile_context>

<pallas_src>
import numpy as np
import jax
import jax.numpy as jnp
from jax import lax
from jax.experimental import pallas as pl
from jax.experimental.pallas import tpu as pltpu


# ----------------------------------------------------------------------------
# Host-side constant construction (glue, replicates the torch helper)
# ----------------------------------------------------------------------------
def get_G_with_window(Nx, Ny, dx, dy, dz, lambda_, w=4, mask_factor=1):
    """Propagation transfer function G (frequency domain)."""
    Mx, My = w * Nx, w * Ny
    # fx varies along columns, fy (descending) varies along rows
    fx_1d = -1.0 / (2 * dx) + np.arange(Mx, dtype=np.float64) * (1.0 / (w * Nx * dx))
    fy_1d = 1.0 / (2 * dy) - np.arange(My, dtype=np.float64) * (1.0 / (w * Ny * dy))
    fx = np.broadcast_to(fx_1d[None, :], (Mx, My))
    fy = np.broadcast_to(fy_1d[:, None], (Mx, My))
    non_ev = (np.abs(fx) ** 2 + np.abs(fy) ** 2) <= (1.0 / lambda_) ** 2 * mask_factor
    arg = (1.0 / lambda_ ** 2 - fx ** 2 - fy ** 2).astype(np.complex128)
    power = 1j * 2.0 * np.pi * np.sqrt(arg) * dz
    G = np.exp(power * non_ev) * non_ev
    return G.astype(np.complex64)


def _dft_slabs(n, lo, cnt, dtype, with_sum):
    """Sliced symmetric-DFT operators, real/imag(/re+im) stacked on axis 0.

    F[j, k] = exp(-2*pi*i*j*k/n), Finv = conj(F)/n.  Returns:
      fwd_cols : F[:, lo:lo+cnt]      (P, n, cnt)
      fwd_rows : F[lo:lo+cnt, :]      (P, cnt, n)
      inv_cols : Finv[:, lo:lo+cnt]   (P, n, cnt)   (== Finv[lo:lo+cnt, :].T)
    P = 3 (re, im, re+im) when with_sum (Karatsuba), else 2.
    """
    j = np.arange(n, dtype=np.int64)[:, None]
    k = (lo + np.arange(cnt, dtype=np.int64))[None, :]
    ph = ((j * k) % n).astype(np.float64) * (2.0 * np.pi / n)
    c, s = np.cos(ph), np.sin(ph)

    def stack(re, im):
        planes = [re, im] + ([re + im] if with_sum else [])
        return jnp.asarray(np.stack(planes, axis=0), dtype)

    fwd_cols = stack(c, -s)
    fwd_rows = stack(c.T, -s.T)
    inv_cols = stack(c / n, s / n)
    return fwd_cols, fwd_rows, inv_cols


def _nbytes(a):
    return int(np.prod(a.shape)) * jnp.dtype(a.dtype).itemsize


# ----------------------------------------------------------------------------
# Pallas kernel
# ----------------------------------------------------------------------------
def _make_asw_kernel(mxu_dtype, karatsuba):
    dt = mxu_dtype
    DN_STD = (((1,), (0,)), ((), ()))    # (m,k) @ (k,n)
    DN_TLHS = (((0,), (0,)), ((), ()))   # (k,m)^T-contracted with (k,n) -> (m,n)

    def mm(a, b, dn):
        return lax.dot_general(a.astype(dt), b.astype(dt), dn,
                               preferred_element_type=jnp.float32)

    def planes(ref):
        return tuple(ref[p] for p in range(ref.shape[0]))

    def cmm(a, b, dn=DN_STD):
        """Complex matmul; a/b are tuples (re, im[, re+im]); returns f32 (re, im)."""
        ar, ai = a[0], a[1]
        br, bi = b[0], b[1]
        if karatsuba:
            asum = a[2] if len(a) > 2 else ar + ai
            bsum = b[2] if len(b) > 2 else br + bi
            p1 = mm(ar, br, dn)
            p2 = mm(ai, bi, dn)
            p3 = mm(asum, bsum, dn)
            return p1 - p2, p3 - p1 - p2
        rr = mm(ar, br, dn)
        ii = mm(ai, bi, dn)
        ri = mm(ar, bi, dn)
        ir = mm(ai, br, dn)
        return rr - ii, ri + ir

    def kernel(x_ref, fr_ref, fc_ref, g_ref, ifrt_ref, ifc_ref, o_ref,
               t1_ref, acc_ref):
        i = pl.program_id(1)

        @pl.when(i == 0)
        def _():
            # T1 = X @ F_N[s1:s1+Ny, :]  -> (Nx, N); once per batch element.
            t1r, t1i = cmm((x_ref[0, 0], x_ref[0, 1]), planes(fr_ref))
            t1_ref[0] = t1r.astype(dt)
            t1_ref[1] = t1i.astype(dt)
            if karatsuba:
                t1_ref[2] = (t1r + t1i).astype(dt)
            acc_ref[...] = jnp.zeros_like(acc_ref)

        # A_blk = F_M[row-block, s0:s0+Nx] @ T1    -> (Mb, N), f32
        ar, ai = cmm(planes(fc_ref), planes(t1_ref))
        # C_blk = A_blk * ifftshift(G)[row-block]  (elementwise, f32 accumulate)
        gr = g_ref[0].astype(jnp.float32)
        gi = g_ref[1].astype(jnp.float32)
        cr = ar * gr - ai * gi
        ci = ar * gi + ai * gr
        # acc += Finv_M[s0:s0+Nx, row-block] @ C_blk   (Finv_M slab stored
        # transposed as (Mb, Nx), so contract over axis 0 of both operands).
        dr, di = cmm(planes(ifrt_ref), (cr, ci), dn=DN_TLHS)
        acc_ref[0] += dr
        acc_ref[1] += di

        @pl.when(i == pl.num_programs(1) - 1)
        def _():
            # out = acc @ Finv_N[:, s1:s1+Ny] -> (Nx, Ny); no misaligned crop.
            out_r, out_i = cmm((acc_ref[0], acc_ref[1]), planes(ifc_ref))
            o_ref[0, 0] = out_r
            o_ref[0, 1] = out_i

    return kernel


def _pick_block_m(m, target=512, align=8):
    """Largest multiple of `align` dividing m that is <= target (else m)."""
    if m <= target:
        return m
    best = 0
    d = align
    while d <= target:
        if m % d == 0:
            best = d
        d += align
    return best if best else m


def _vmem_limit_bytes():
    """Per-generation VMEM limit with ~20% headroom for compiler scratch."""
    cap = 0
    try:  # hardware capability probe only; never masks kernel errors
        cap = int(getattr(pltpu.get_tpu_info(), "vmem_capacity_bytes", 0) or 0)
    except Exception:
        cap = 0
    if cap <= 0:
        cap = 64 * 1024 * 1024          # conservative default (v7x per-TC)
    return int(max(32 << 20, min(cap - cap // 5, 110 << 20)))


def asw_propagate_pallas(x, fr, fc, g, ifrt, ifc, *, block_m=None):
    """x: (B, 2, Nx, Ny) f32 real/imag planes.  Returns (B, 2, Nx, Ny) f32.

    fr   : (P, Ny, N)   F_N[s1:s1+Ny, :]
    fc   : (P, M, Nx)   F_M[:, s0:s0+Nx]
    g    : (2, M, N)    ifftshift(G)
    ifrt : (P, M, Nx)   Finv_M[s0:s0+Nx, :] stored transposed
    ifc  : (P, N, Ny)   Finv_N[:, s1:s1+Ny]
    P = 3 when Karatsuba sum planes are precomputed, else 2.
    """
    B, _, Nx, Ny = x.shape
    P, M, _ = fc.shape
    N = fr.shape[2]
    karatsuba = (P == 3)
    mb = block_m if block_m is not None else _pick_block_m(M)
    assert M % mb == 0 and (mb == M or mb % 8 == 0), (M, mb)
    n_blocks = M // mb

    kernel = _make_asw_kernel(fc.dtype, karatsuba)

    grid_spec = pltpu.PrefetchScalarGridSpec(
        num_scalar_prefetch=0,
        grid=(B, n_blocks),
        in_specs=[
            pl.BlockSpec((1, 2, Nx, Ny), lambda b, i: (b, 0, 0, 0)),  # field
            pl.BlockSpec((P, Ny, N),     lambda b, i: (0, 0, 0)),     # F_N rows (resident)
            pl.BlockSpec((P, mb, Nx),    lambda b, i: (0, i, 0)),     # F_M col slab (streamed)
            pl.BlockSpec((2, mb, N),     lambda b, i: (0, i, 0)),     # ifftshift(G) (streamed)
            pl.BlockSpec((P, mb, Nx),    lambda b, i: (0, i, 0)),     # Finv_M slab^T (streamed)
            pl.BlockSpec((P, N, Ny),     lambda b, i: (0, 0, 0)),     # Finv_N cols (resident)
        ],
        out_specs=pl.BlockSpec((1, 2, Nx, Ny), lambda b, i: (b, 0, 0, 0)),
        scratch_shapes=[
            pltpu.VMEM((P, Nx, N), fc.dtype),      # T1 = X @ F_N rows
            pltpu.VMEM((2, Nx, N), jnp.float32),   # f32 accumulator
        ],
    )

    n_mm = 3 if karatsuba else 4
    flops = int(2 * n_mm * B *
                (Nx * Ny * N + M * Nx * N + Nx * M * N + Nx * N * Ny))
    bytes_accessed = int(2 * _nbytes(x)
                         + B * (_nbytes(g) + _nbytes(fc) + _nbytes(ifrt))
                         + _nbytes(fr) + _nbytes(ifc))

    return pl.pallas_call(
        kernel,
        out_shape=jax.ShapeDtypeStruct((B, 2, Nx, Ny), jnp.float32),
        grid_spec=grid_spec,
        compiler_params=pltpu.CompilerParams(
            dimension_semantics=("parallel", "arbitrary"),
            vmem_limit_bytes=_vmem_limit_bytes(),
        ),
        cost_estimate=pl.CostEstimate(flops=flops, transcendentals=0,
                                      bytes_accessed=bytes_accessed),
    )(x, fr, fc, g, ifrt, ifc)


# ----------------------------------------------------------------------------
# JAX/Pallas equivalent of d2nnASwWindow_layer
# ----------------------------------------------------------------------------
class D2nnASwWindowLayerPallas:
    def __init__(self, Nx, Ny, dx, dy, dz, lambda_, window_size=4, mask_factor=1,
                 mxu_dtype=jnp.bfloat16, karatsuba=None, block_m=None):
        self.Nx, self.Ny = Nx, Ny
        self.dx, self.dy = dx * 1e-6, dy * 1e-6
        self.dz = dz * 1e-6
        self.lambda_ = lambda_ * 1e-6
        self.w = window_size
        self.mask_factor = mask_factor
        self.mxu_dtype = mxu_dtype
        self.block_m = block_m
        # Karatsuba (3-mult) only on the f32 path; bf16 uses the 4-mult form to
        # avoid the p3-p1-p2 cancellation at long (K up to w*Nx) contractions.
        if karatsuba is None:
            karatsuba = (jnp.dtype(mxu_dtype) == jnp.dtype(jnp.float32))
        self.karatsuba = bool(karatsuba)

        M, N = self.w * self.Nx, self.w * self.Ny
        s0 = (self.w - 1) * self.Nx // 2
        s1 = (self.w - 1) * self.Ny // 2
        # Sliced DFT operators (zero-pad / crop structure folded in), stored in
        # the MXU dtype, with precomputed re+im sum planes when Karatsuba.
        self.fc, _, self.ifrt = _dft_slabs(M, s0, self.Nx, mxu_dtype, self.karatsuba)
        _, self.fr, self.ifc = _dft_slabs(N, s1, self.Ny, mxu_dtype, self.karatsuba)

        # NOTE: the torch __init__ builds G with get_G_with_window() *defaults*
        # (Nx=Ny=300), which is shape-incompatible with forward() for other
        # sizes; we build G with this layer's own parameters (equivalent to
        # calling find_transfer_function(dz, mask_factor)).
        self._build_g()

    def _build_g(self):
        G = get_G_with_window(Nx=self.Nx, Ny=self.Ny, dx=self.dx, dy=self.dy,
                              dz=self.dz, lambda_=self.lambda_, w=self.w,
                              mask_factor=self.mask_factor)
        Gs = np.fft.ifftshift(G)          # fold fftshift/ifftshift into G
        self.g = jnp.asarray(np.stack([np.real(Gs), np.imag(Gs)], axis=0),
                             self.mxu_dtype)         # (2, M, N)

    def find_transfer_function(self, dz_, mask_factor_):
        self.dz = dz_ * 1e-6
        self.mask_factor = mask_factor_
        self._build_g()

    def __call__(self, input_e_field):
        B = input_e_field.shape[0]
        x = input_e_field.reshape(B, self.Nx, self.Ny).astype(jnp.complex64)
        xs = jnp.stack([jnp.real(x), jnp.imag(x)], axis=1).astype(jnp.float32)
        out = asw_propagate_pallas(xs, self.fr, self.fc, self.g, self.ifrt,
                                   self.ifc, block_m=self.block_m)
        return (out[:, 0] + 1j * out[:, 1]).astype(jnp.complex64)


# ----------------------------------------------------------------------------
# Pure-JAX reference (FFT based) for validation
# ----------------------------------------------------------------------------
def reference_forward(layer, input_e_field):
    B = input_e_field.shape[0]
    x = input_e_field.reshape(B, layer.Nx, layer.Ny).astype(jnp.complex64)
    M, N = layer.w * layer.Nx, layer.w * layer.Ny
    s0 = (layer.w - 1) * layer.Nx // 2
    s1 = (layer.w - 1) * layer.Ny // 2
    pad = jnp.zeros((B, M, N), jnp.complex64)
    pad = pad.at[:, s0:s0 + layer.Nx, s1:s1 + layer.Ny].set(x)
    G = jnp.asarray(get_G_with_window(Nx=layer.Nx, Ny=layer.Ny, dx=layer.dx,
                                      dy=layer.dy, dz=layer.dz,
                                      lambda_=layer.lambda_, w=layer.w,
                                      mask_factor=layer.mask_factor))
    A = jnp.fft.fftshift(jnp.fft.fft2(pad), axes=(-2, -1)) * G[None]
    Bf = jnp.fft.ifft2(jnp.fft.ifftshift(A, axes=(-2, -1)))
    return Bf[:, s0:s0 + layer.Nx, s1:s1 + layer.Ny]


if __name__ == "__main__":
    key = jax.random.PRNGKey(0)
    batch, Nx, Ny = 2, 16, 16
    k1, k2 = jax.random.split(key)
    x = (jax.random.normal(k1, (batch, Nx, Ny), dtype=jnp.float32)
         + 1j * jax.random.normal(k2, (batch, Nx, Ny), dtype=jnp.float32)
         ).astype(jnp.complex64)

    common = dict(Nx=Nx, Ny=Ny, dx=300.0, dy=300.0, dz=4000.0, lambda_=750.0,
                  window_size=4, mask_factor=1)

    # f32 MXU + Karatsuba (validation mode): matches the FFT reference tightly.
    layer_f32 = D2nnASwWindowLayerPallas(mxu_dtype=jnp.float32, **common)
    ref = jax.block_until_ready(reference_forward(layer_f32, x))
    out = jax.block_until_ready(layer_f32(x))
    assert out.shape == (batch, Nx, Ny) and out.dtype == jnp.complex64
    np.testing.assert_allclose(np.asarray(out), np.asarray(ref),
                               atol=2e-3, rtol=2e-3)

    # Same math with several streamed row blocks (block_m=16 -> 4 grid steps):
    # exercises the accumulate-over-the-"arbitrary"-axis path used at
    # production size.
    layer_stream = D2nnASwWindowLayerPallas(mxu_dtype=jnp.float32,
                                            block_m=16, **common)
    out_s = jax.block_until_ready(layer_stream(x))
    np.testing.assert_allclose(np.asarray(out_s), np.asarray(ref),
                               atol=2e-3, rtol=2e-3)

    # Production default: bf16 MXU operands + bf16 G (f32 accumulation,
    # 4-multiplication complex matmul): validated at a bf16 tolerance.
    layer_bf16 = D2nnASwWindowLayerPallas(**common)
    out_bf16 = jax.block_until_ready(layer_bf16(x))
    np.testing.assert_allclose(np.asarray(out_bf16), np.asarray(ref),
                               atol=5e-2, rtol=5e-2)

    print("KERNEL_OK")
</pallas_src>

<mosaic_0001>
module attributes {stable_mosaic.version = 11 : i64} {
  func.func @kernel(%arg0: i32, %arg1: i32, %arg2: memref<1x2x16x16xf32, #tpu.memory_space<vmem>>, %arg3: memref<3x16x64xf32, #tpu.memory_space<vmem>>, %arg4: memref<3x64x16xf32, #tpu.memory_space<vmem>>, %arg5: memref<2x64x64xf32, #tpu.memory_space<vmem>>, %arg6: memref<3x64x16xf32, #tpu.memory_space<vmem>>, %arg7: memref<3x64x16xf32, #tpu.memory_space<vmem>>, %arg8: memref<1x2x16x16xf32, #tpu.memory_space<vmem>>, %arg9: memref<3x16x64xf32, #tpu.memory_space<vmem>>, %arg10: memref<2x16x64xf32, #tpu.memory_space<vmem>>) attributes {dimension_semantics = [#tpu.dimension_semantics<parallel>, #tpu.dimension_semantics<arbitrary>], iteration_bounds = array<i64: 2, 1>, scalar_prefetch = 0 : i64, scratch_operands = 2 : i64, tpu.core_type = #tpu.core_type<tc>, window_params = [{transform_indices = @transform_0, window_bounds = array<i64: 1, 2, 16, 16>}, {pipeline_mode = #tpu.pipeline_mode<synchronous>, transform_indices = @transform_1, window_bounds = array<i64: 3, 16, 64>}, {transform_indices = @transform_2, window_bounds = array<i64: 3, 64, 16>}, {transform_indices = @transform_3, window_bounds = array<i64: 2, 64, 64>}, {transform_indices = @transform_4, window_bounds = array<i64: 3, 64, 16>}, {pipeline_mode = #tpu.pipeline_mode<synchronous>, transform_indices = @transform_5, window_bounds = array<i64: 3, 64, 16>}, {transform_indices = @transform_6, window_bounds = array<i64: 1, 2, 16, 16>}]} {
    %c0_i32 = arith.constant 0 : i32
    %0 = arith.cmpi eq, %arg1, %c0_i32 : i32
    %1 = arith.extui %0 : i1 to i32
    %c0_i32_0 = arith.constant 0 : i32
    %2 = arith.cmpi ne, %1, %c0_i32_0 : i32
    scf.if %2 {
      %c0_50 = arith.constant 0 : index
      %c0_51 = arith.constant 0 : index
      %c0_52 = arith.constant 0 : index
      %c0_53 = arith.constant 0 : index
      %59 = vector.load %arg2[%c0_50, %c0_51, %c0_52, %c0_53] : memref<1x2x16x16xf32, #tpu.memory_space<vmem>>, vector<1x1x16x16xf32>
      %60 = vector.shape_cast %59 : vector<1x1x16x16xf32> to vector<16x16xf32>
      %c0_54 = arith.constant 0 : index
      %c1_55 = arith.constant 1 : index
      %c0_56 = arith.constant 0 : index
      %c0_57 = arith.constant 0 : index
      %61 = vector.load %arg2[%c0_54, %c1_55, %c0_56, %c0_57] : memref<1x2x16x16xf32, #tpu.memory_space<vmem>>, vector<1x1x16x16xf32>
      %62 = vector.shape_cast %61 : vector<1x1x16x16xf32> to vector<16x16xf32>
      %c0_58 = arith.constant 0 : index
      %c0_59 = arith.constant 0 : index
      %c0_60 = arith.constant 0 : index
      %63 = vector.load %arg3[%c0_58, %c0_59, %c0_60] : memref<3x16x64xf32, #tpu.memory_space<vmem>>, vector<1x16x64xf32>
      %64 = vector.shape_cast %63 : vector<1x16x64xf32> to vector<16x64xf32>
      %c1_61 = arith.constant 1 : index
      %c0_62 = arith.constant 0 : index
      %c0_63 = arith.constant 0 : index
      %65 = vector.load %arg3[%c1_61, %c0_62, %c0_63] : memref<3x16x64xf32, #tpu.memory_space<vmem>>, vector<1x16x64xf32>
      %66 = vector.shape_cast %65 : vector<1x16x64xf32> to vector<16x64xf32>
      %c2_64 = arith.constant 2 : index
      %c0_65 = arith.constant 0 : index
      %c0_66 = arith.constant 0 : index
      %67 = vector.load %arg3[%c2_64, %c0_65, %c0_66] : memref<3x16x64xf32, #tpu.memory_space<vmem>>, vector<1x16x64xf32>
      %68 = vector.shape_cast %67 : vector<1x16x64xf32> to vector<16x64xf32>
      %69 = arith.addf %60, %62 : vector<16x16xf32>
      %cst_67 = arith.constant dense<0.000000e+00> : vector<16x64xf32>
      %70 = tpu.matmul %60, %64, %cst_67 {dimension_numbers = #tpu.dot_dimension_numbers<[1], [0], [0], [1], [0, 0, 1, 1], [], []>} : vector<16x16xf32>, vector<16x64xf32>, vector<16x64xf32> -> vector<16x64xf32>
      %cst_68 = arith.constant dense<0.000000e+00> : vector<16x64xf32>
      %71 = tpu.matmul %62, %66, %cst_68 {dimension_numbers = #tpu.dot_dimension_numbers<[1], [0], [0], [1], [0, 0, 1, 1], [], []>} : vector<16x16xf32>, vector<16x64xf32>, vector<16x64xf32> -> vector<16x64xf32>
      %cst_69 = arith.constant dense<0.000000e+00> : vector<16x64xf32>
      %72 = tpu.matmul %69, %68, %cst_69 {dimension_numbers = #tpu.dot_dimension_numbers<[1], [0], [0], [1], [0, 0, 1, 1], [], []>} : vector<16x16xf32>, vector<16x64xf32>, vector<16x64xf32> -> vector<16x64xf32>
      %73 = arith.subf %70, %71 : vector<16x64xf32>
      %74 = arith.subf %72, %70 : vector<16x64xf32>
      %75 = arith.subf %74, %71 : vector<16x64xf32>
      %c0_70 = arith.constant 0 : index
      %c0_71 = arith.constant 0 : index
      %c0_72 = arith.constant 0 : index
      %76 = vector.load %arg9[%c0_70, %c0_71, %c0_72] : memref<3x16x64xf32, #tpu.memory_space<vmem>>, vector<1x16x64xf32>
      %77 = vector.shape_cast %76 : vector<1x16x64xf32> to vector<16x64xf32>
      %78 = vector.shape_cast %73 : vector<16x64xf32> to vector<1x16x64xf32>
      tpu.vector_store %arg9[%c0_70, %c0_71, %c0_72], %78 {strides = array<i32>} : memref<3x16x64xf32, #tpu.memory_space<vmem>>, vector<1x16x64xf32>,
      %c1_73 = arith.constant 1 : index
      %c0_74 = arith.constant 0 : index
      %c0_75 = arith.constant 0 : index
      %79 = vector.load %arg9[%c1_73, %c0_74, %c0_75] : memref<3x16x64xf32, #tpu.memory_space<vmem>>, vector<1x16x64xf32>
      %80 = vector.shape_cast %79 : vector<1x16x64xf32> to vector<16x64xf32>
      %81 = vector.shape_cast %75 : vector<16x64xf32> to vector<1x16x64xf32>
      tpu.vector_store %arg9[%c1_73, %c0_74, %c0_75], %81 {strides = array<i32>} : memref<3x16x64xf32, #tpu.memory_space<vmem>>, vector<1x16x64xf32>,
      %82 = arith.addf %73, %75 : vector<16x64xf32>
      %c2_76 = arith.constant 2 : index
      %c0_77 = arith.constant 0 : index
      %c0_78 = arith.constant 0 : index
      %83 = vector.load %arg9[%c2_76, %c0_77, %c0_78] : memref<3x16x64xf32, #tpu.memory_space<vmem>>, vector<1x16x64xf32>
      %84 = vector.shape_cast %83 : vector<1x16x64xf32> to vector<16x64xf32>
      %85 = vector.shape_cast %82 : vector<16x64xf32> to vector<1x16x64xf32>
      tpu.vector_store %arg9[%c2_76, %c0_77, %c0_78], %85 {strides = array<i32>} : memref<3x16x64xf32, #tpu.memory_space<vmem>>, vector<1x16x64xf32>,
      %cst_79 = arith.constant 0.000000e+00 : f32
      %86 = vector.broadcast %cst_79 : f32 to vector<2x16x64xf32>
      %c0_80 = arith.constant 0 : index
      %c0_81 = arith.constant 0 : index
      %c0_82 = arith.constant 0 : index
      %87 = vector.load %arg10[%c0_80, %c0_81, %c0_82] : memref<2x16x64xf32, #tpu.memory_space<vmem>>, vector<2x16x64xf32>
      tpu.vector_store %arg10[%c0_80, %c0_81, %c0_82], %86 {strides = array<i32>} : memref<2x16x64xf32, #tpu.memory_space<vmem>>, vector<2x16x64xf32>,
    } else {
    }
    %c0 = arith.constant 0 : index
    %c0_1 = arith.constant 0 : index
    %c0_2 = arith.constant 0 : index
    %3 = vector.load %arg4[%c0, %c0_1, %c0_2] : memref<3x64x16xf32, #tpu.memory_space<vmem>>, vector<1x64x16xf32>
    %4 = vector.shape_cast %3 : vector<1x64x16xf32> to vector<64x16xf32>
    %c1 = arith.constant 1 : index
    %c0_3 = arith.constant 0 : index
    %c0_4 = arith.constant 0 : index
    %5 = vector.load %arg4[%c1, %c0_3, %c0_4] : memref<3x64x16xf32, #tpu.memory_space<vmem>>, vector<1x64x16xf32>
    %6 = vector.shape_cast %5 : vector<1x64x16xf32> to vector<64x16xf32>
    %c2 = arith.constant 2 : index
    %c0_5 = arith.constant 0 : index
    %c0_6 = arith.constant 0 : index
    %7 = vector.load %arg4[%c2, %c0_5, %c0_6] : memref<3x64x16xf32, #tpu.memory_space<vmem>>, vector<1x64x16xf32>
    %8 = vector.shape_cast %7 : vector<1x64x16xf32> to vector<64x16xf32>
    %c0_7 = arith.constant 0 : index
    %c0_8 = arith.constant 0 : index
    %c0_9 = arith.constant 0 : index
    %9 = vector.load %arg9[%c0_7, %c0_8, %c0_9] : memref<3x16x64xf32, #tpu.memory_space<vmem>>, vector<1x16x64xf32>
    %10 = vector.shape_cast %9 : vector<1x16x64xf32> to vector<16x64xf32>
    %c1_10 = arith.constant 1 : index
    %c0_11 = arith.constant 0 : index
    %c0_12 = arith.constant 0 : index
    %11 = vector.load %arg9[%c1_10, %c0_11, %c0_12] : memref<3x16x64xf32, #tpu.memory_space<vmem>>, vector<1x16x64xf32>
    %12 = vector.shape_cast %11 : vector<1x16x64xf32> to vector<16x64xf32>
    %c2_13 = arith.constant 2 : index
    %c0_14 = arith.constant 0 : index
    %c0_15 = arith.constant 0 : index
    %13 = vector.load %arg9[%c2_13, %c0_14, %c0_15] : memref<3x16x64xf32, #tpu.memory_space<vmem>>, vector<1x16x64xf32>
    %14 = vector.shape_cast %13 : vector<1x16x64xf32> to vector<16x64xf32>
    %cst = arith.constant dense<0.000000e+00> : vector<64x64xf32>
    %15 = tpu.matmul %4, %10, %cst {dimension_numbers = #tpu.dot_dimension_numbers<[1], [0], [0], [1], [0, 0, 1, 1], [], []>} : vector<64x16xf32>, vector<16x64xf32>, vector<64x64xf32> -> vector<64x64xf32>
    %cst_16 = arith.constant dense<0.000000e+00> : vector<64x64xf32>
    %16 = tpu.matmul %6, %12, %cst_16 {dimension_numbers = #tpu.dot_dimension_numbers<[1], [0], [0], [1], [0, 0, 1, 1], [], []>} : vector<64x16xf32>, vector<16x64xf32>, vector<64x64xf32> -> vector<64x64xf32>
    %cst_17 = arith.constant dense<0.000000e+00> : vector<64x64xf32>
    %17 = tpu.matmul %8, %14, %cst_17 {dimension_numbers = #tpu.dot_dimension_numbers<[1], [0], [0], [1], [0, 0, 1, 1], [], []>} : vector<64x16xf32>, vector<16x64xf32>, vector<64x64xf32> -> vector<64x64xf32>
    %18 = arith.subf %15, %16 : vector<64x64xf32>
    %19 = arith.subf %17, %15 : vector<64x64xf32>
    %20 = arith.subf %19, %16 : vector<64x64xf32>
    %c0_18 = arith.constant 0 : index
    %c0_19 = arith.constant 0 : index
    %c0_20 = arith.constant 0 : index
    %21 = vector.load %arg5[%c0_18, %c0_19, %c0_20] : memref<2x64x64xf32, #tpu.memory_space<vmem>>, vector<1x64x64xf32>
    %22 = vector.shape_cast %21 : vector<1x64x64xf32> to vector<64x64xf32>
    %c1_21 = arith.constant 1 : index
    %c0_22 = arith.constant 0 : index
    %c0_23 = arith.constant 0 : index
    %23 = vector.load %arg5[%c1_21, %c0_22, %c0_23] : memref<2x64x64xf32, #tpu.memory_space<vmem>>, vector<1x64x64xf32>
    %24 = vector.shape_cast %23 : vector<1x64x64xf32> to vector<64x64xf32>
    %25 = arith.mulf %18, %22 : vector<64x64xf32>
    %26 = arith.mulf %20, %24 : vector<64x64xf32>
    %27 = arith.subf %25, %26 : vector<64x64xf32>
    %28 = arith.mulf %18, %24 : vector<64x64xf32>
    %29 = arith.mulf %20, %22 : vector<64x64xf32>
    %30 = arith.addf %28, %29 : vector<64x64xf32>
    %c0_24 = arith.constant 0 : index
    %c0_25 = arith.constant 0 : index
    %c0_26 = arith.constant 0 : index
    %31 = vector.load %arg6[%c0_24, %c0_25, %c0_26] : memref<3x64x16xf32, #tpu.memory_space<vmem>>, vector<1x64x16xf32>
    %32 = vector.shape_cast %31 : vector<1x64x16xf32> to vector<64x16xf32>
    %c1_27 = arith.constant 1 : index
    %c0_28 = arith.constant 0 : index
    %c0_29 = arith.constant 0 : index
    %33 = vector.load %arg6[%c1_27, %c0_28, %c0_29] : memref<3x64x16xf32, #tpu.memory_space<vmem>>, vector<1x64x16xf32>
    %34 = vector.shape_cast %33 : vector<1x64x16xf32> to vector<64x16xf32>
    %c2_30 = arith.constant 2 : index
    %c0_31 = arith.constant 0 : index
    %c0_32 = arith.constant 0 : index
    %35 = vector.load %arg6[%c2_30, %c0_31, %c0_32] : memref<3x64x16xf32, #tpu.memory_space<vmem>>, vector<1x64x16xf32>
    %36 = vector.shape_cast %35 : vector<1x64x16xf32> to vector<64x16xf32>
    %37 = arith.addf %27, %30 : vector<64x64xf32>
    %cst_33 = arith.constant dense<0.000000e+00> : vector<16x64xf32>
    %38 = tpu.matmul %32, %27, %cst_33 {dimension_numbers = #tpu.dot_dimension_numbers<[0], [0], [1], [1], [0, 1, 1, 1], [], []>} : vector<64x16xf32>, vector<64x64xf32>, vector<16x64xf32> -> vector<16x64xf32>
    %cst_34 = arith.constant dense<0.000000e+00> : vector<16x64xf32>
    %39 = tpu.matmul %34, %30, %cst_34 {dimension_numbers = #tpu.dot_dimension_numbers<[0], [0], [1], [1], [0, 1, 1, 1], [], []>} : vector<64x16xf32>, vector<64x64xf32>, vector<16x64xf32> -> vector<16x64xf32>
    %cst_35 = arith.constant dense<0.000000e+00> : vector<16x64xf32>
    %40 = tpu.matmul %36, %37, %cst_35 {dimension_numbers = #tpu.dot_dimension_numbers<[0], [0], [1], [1], [0, 1, 1, 1], [], []>} : vector<64x16xf32>, vector<64x64xf32>, vector<16x64xf32> -> vector<16x64xf32>
    %41 = arith.subf %38, %39 : vector<16x64xf32>
    %42 = arith.subf %40, %38 : vector<16x64xf32>
    %43 = arith.subf %42, %39 : vector<16x64xf32>
    %c0_36 = arith.constant 0 : index
    %c0_37 = arith.constant 0 : index
    %c0_38 = arith.constant 0 : index
    %44 = vector.load %arg10[%c0_36, %c0_37, %c0_38] : memref<2x16x64xf32, #tpu.memory_space<vmem>>, vector<1x16x64xf32>
    %45 = vector.shape_cast %44 : vector<1x16x64xf32> to vector<16x64xf32>
    %46 = arith.addf %45, %41 : vector<16x64xf32>
    %c0_39 = arith.constant 0 : index
    %c0_40 = arith.constant 0 : index
    %c0_41 = arith.constant 0 : index
    %47 = vector.load %arg10[%c0_39, %c0_40, %c0_41] : memref<2x16x64xf32, #tpu.memory_space<vmem>>, vector<1x16x64xf32>
    %48 = vector.shape_cast %47 : vector<1x16x64xf32> to vector<16x64xf32>
    %49 = vector.shape_cast %46 : vector<16x64xf32> to vector<1x16x64xf32>
    tpu.vector_store %arg10[%c0_39, %c0_40, %c0_41], %49 {strides = array<i32>} : memref<2x16x64xf32, #tpu.memory_space<vmem>>, vector<1x16x64xf32>,
    %c1_42 = arith.constant 1 : index
    %c0_43 = arith.constant 0 : index
    %c0_44 = arith.constant 0 : index
    %50 = vector.load %arg10[%c1_42, %c0_43, %c0_44] : memref<2x16x64xf32, #tpu.memory_space<vmem>>, vector<1x16x64xf32>
    %51 = vector.shape_cast %50 : vector<1x16x64xf32> to vector<16x64xf32>
    %52 = arith.addf %51, %43 : vector<16x64xf32>
    %c1_45 = arith.constant 1 : index
    %c0_46 = arith.constant 0 : index
    %c0_47 = arith.constant 0 : index
    %53 = vector.load %arg10[%c1_45, %c0_46, %c0_47] : memref<2x16x64xf32, #tpu.memory_space<vmem>>, vector<1x16x64xf32>
    %54 = vector.shape_cast %53 : vector<1x16x64xf32> to vector<16x64xf32>
    %55 = vector.shape_cast %52 : vector<16x64xf32> to vector<1x16x64xf32>
    tpu.vector_store %arg10[%c1_45, %c0_46, %c0_47], %55 {strides = array<i32>} : memref<2x16x64xf32, #tpu.memory_space<vmem>>, vector<1x16x64xf32>,
    %c0_i32_48 = arith.constant 0 : i32
    %56 = arith.cmpi eq, %arg1, %c0_i32_48 : i32
    %57 = arith.extui %56 : i1 to i32
    %c0_i32_49 = arith.constant 0 : i32
    %58 = arith.cmpi ne, %57, %c0_i32_49 : i32
    scf.if %58 {
      %c0_50 = arith.constant 0 : index
      %c0_51 = arith.constant 0 : index
      %c0_52 = arith.constant 0 : index
      %59 = vector.load %arg10[%c0_50, %c0_51, %c0_52] : memref<2x16x64xf32, #tpu.memory_space<vmem>>, vector<1x16x64xf32>
      %60 = vector.shape_cast %59 : vector<1x16x64xf32> to vector<16x64xf32>
      %c1_53 = arith.constant 1 : index
      %c0_54 = arith.constant 0 : index
      %c0_55 = arith.constant 0 : index
      %61 = vector.load %arg10[%c1_53, %c0_54, %c0_55] : memref<2x16x64xf32, #tpu.memory_space<vmem>>, vector<1x16x64xf32>
      %62 = vector.shape_cast %61 : vector<1x16x64xf32> to vector<16x64xf32>
      %c0_56 = arith.constant 0 : index
      %c0_57 = arith.constant 0 : index
      %c0_58 = arith.constant 0 : index
      %63 = vector.load %arg7[%c0_56, %c0_57, %c0_58] : memref<3x64x16xf32, #tpu.memory_space<vmem>>, vector<1x64x16xf32>
      %64 = vector.shape_cast %63 : vector<1x64x16xf32> to vector<64x16xf32>
      %c1_59 = arith.constant 1 : index
      %c0_60 = arith.constant 0 : index
      %c0_61 = arith.constant 0 : index
      %65 = vector.load %arg7[%c1_59, %c0_60, %c0_61] : memref<3x64x16xf32, #tpu.memory_space<vmem>>, vector<1x64x16xf32>
      %66 = vector.shape_cast %65 : vector<1x64x16xf32> to vector<64x16xf32>
      %c2_62 = arith.constant 2 : index
      %c0_63 = arith.constant 0 : index
      %c0_64 = arith.constant 0 : index
      %67 = vector.load %arg7[%c2_62, %c0_63, %c0_64] : memref<3x64x16xf32, #tpu.memory_space<vmem>>, vector<1x64x16xf32>
      %68 = vector.shape_cast %67 : vector<1x64x16xf32> to vector<64x16xf32>
      %69 = arith.addf %60, %62 : vector<16x64xf32>
      %cst_65 = arith.constant dense<0.000000e+00> : vector<16x16xf32>
      %70 = tpu.matmul %60, %64, %cst_65 {dimension_numbers = #tpu.dot_dimension_numbers<[1], [0], [0], [1], [0, 0, 1, 1], [], []>} : vector<16x64xf32>, vector<64x16xf32>, vector<16x16xf32> -> vector<16x16xf32>
      %cst_66 = arith.constant dense<0.000000e+00> : vector<16x16xf32>
      %71 = tpu.matmul %62, %66, %cst_66 {dimension_numbers = #tpu.dot_dimension_numbers<[1], [0], [0], [1], [0, 0, 1, 1], [], []>} : vector<16x64xf32>, vector<64x16xf32>, vector<16x16xf32> -> vector<16x16xf32>
      %cst_67 = arith.constant dense<0.000000e+00> : vector<16x16xf32>
      %72 = tpu.matmul %69, %68, %cst_67 {dimension_numbers = #tpu.dot_dimension_numbers<[1], [0], [0], [1], [0, 0, 1, 1], [], []>} : vector<16x64xf32>, vector<64x16xf32>, vector<16x16xf32> -> vector<16x16xf32>
      %73 = arith.subf %70, %71 : vector<16x16xf32>
      %74 = arith.subf %72, %70 : vector<16x16xf32>
      %75 = arith.subf %74, %71 : vector<16x16xf32>
      %c0_68 = arith.constant 0 : index
      %c0_69 = arith.constant 0 : index
      %c0_70 = arith.constant 0 : index
      %c0_71 = arith.constant 0 : index
      %76 = vector.load %arg8[%c0_68, %c0_69, %c0_70, %c0_71] : memref<1x2x16x16xf32, #tpu.memory_space<vmem>>, vector<1x1x16x16xf32>
      %77 = vector.shape_cast %76 : vector<1x1x16x16xf32> to vector<16x16xf32>
      %78 = vector.shape_cast %73 : vector<16x16xf32> to vector<1x1x16x16xf32>
      tpu.vector_store %arg8[%c0_68, %c0_69, %c0_70, %c0_71], %78 {strides = array<i32>} : memref<1x2x16x16xf32, #tpu.memory_space<vmem>>, vector<1x1x16x16xf32>,
      %c0_72 = arith.constant 0 : index
      %c1_73 = arith.constant 1 : index
      %c0_74 = arith.constant 0 : index
      %c0_75 = arith.constant 0 : index
      %79 = vector.load %arg8[%c0_72, %c1_73, %c0_74, %c0_75] : memref<1x2x16x16xf32, #tpu.memory_space<vmem>>, vector<1x1x16x16xf32>
      %80 = vector.shape_cast %79 : vector<1x1x16x16xf32> to vector<16x16xf32>
      %81 = vector.shape_cast %75 : vector<16x16xf32> to vector<1x1x16x16xf32>
      tpu.vector_store %arg8[%c0_72, %c1_73, %c0_74, %c0_75], %81 {strides = array<i32>} : memref<1x2x16x16xf32, #tpu.memory_space<vmem>>, vector<1x1x16x16xf32>,
    } else {
    }
    return
  }
  func.func @transform_0(%arg0: i32, %arg1: i32) -> (i32, i32, i32, i32) {
    %c0_i32 = arith.constant 0 : i32
    %c0_i32_0 = arith.constant 0 : i32
    %c0_i32_1 = arith.constant 0 : i32
    %c0_i32_2 = arith.constant 0 : i32
    return %arg0, %c0_i32, %c0_i32_0, %c0_i32_1 : i32, i32, i32, i32
  }
  func.func @transform_1(%arg0: i32, %arg1: i32) -> (i32, i32, i32) {
    %c0_i32 = arith.constant 0 : i32
    %c0_i32_0 = arith.constant 0 : i32
    %c0_i32_1 = arith.constant 0 : i32
    %c0_i32_2 = arith.constant 0 : i32
    return %c0_i32, %c0_i32_0, %c0_i32_1 : i32, i32, i32
  }
  func.func @transform_2(%arg0: i32, %arg1: i32) -> (i32, i32, i32) {
    %c0_i32 = arith.constant 0 : i32
    %c0_i32_0 = arith.constant 0 : i32
    %c0_i32_1 = arith.constant 0 : i32
    return %c0_i32, %arg1, %c0_i32_0 : i32, i32, i32
  }
  func.func @transform_3(%arg0: i32, %arg1: i32) -> (i32, i32, i32) {
    %c0_i32 = arith.constant 0 : i32
    %c0_i32_0 = arith.constant 0 : i32
    %c0_i32_1 = arith.constant 0 : i32
    return %c0_i32, %arg1, %c0_i32_0 : i32, i32, i32
  }
  func.func @transform_4(%arg0: i32, %arg1: i32) -> (i32, i32, i32) {
    %c0_i32 = arith.constant 0 : i32
    %c0_i32_0 = arith.constant 0 : i32
    %c0_i32_1 = arith.constant 0 : i32
    return %c0_i32, %arg1, %c0_i32_0 : i32, i32, i32
  }
  func.func @transform_5(%arg0: i32, %arg1: i32) -> (i32, i32, i32) {
    %c0_i32 = arith.constant 0 : i32
    %c0_i32_0 = arith.constant 0 : i32
    %c0_i32_1 = arith.constant 0 : i32
    %c0_i32_2 = arith.constant 0 : i32
    return %c0_i32, %c0_i32_0, %c0_i32_1 : i32, i32, i32
  }
  func.func @transform_6(%arg0: i32, %arg1: i32) -> (i32, i32, i32, i32) {
    %c0_i32 = arith.constant 0 : i32
    %c0_i32_0 = arith.constant 0 : i32
    %c0_i32_1 = arith.constant 0 : i32
    %c0_i32_2 = arith.constant 0 : i32
    return %arg0, %c0_i32, %c0_i32_0, %c0_i32_1 : i32, i32, i32, i32
  }
}

</mosaic_0001>

<bundles_post_ra>
// kernel: tpu_custom_call.1
= control target key start
LH: loop header
LB: loop body
LE: loop exit
PB: predicated region body
PF: predicated region fallthrough
CT: control target
= control target key end

     0   :  { %11 = vsyncpa [#allocation5], 0  ;;  %s2048_s0 = inlined_call_operand.vmem [shape: f32[2,2,16,16], index: 0, kind: input, shape index: {}]   ;;  %s2049_s1 = inlined_call_operand.vmem [shape: f32[3,16,64], index: 1, kind: input, shape index: {}]   ;;  %s2050_s2 = inlined_call_operand.vmem [shape: f32[3,64,16], index: 2, kind: input, shape index: {}]   ;;  %s2051_s3 = inlined_call_operand.vmem [shape: f32[2,64,64], index: 3, kind: input, shape index: {}]   ;;  %s2052_s4 = inlined_call_operand.vmem [shape: f32[3,64,16], index: 4, kind: input, shape index: {}]   ;;  %s2053_s5 = inlined_call_operand.vmem [shape: f32[3,64,16], index: 5, kind: input, shape index: {}]   ;;  %s2054_s6 = inlined_call_operand.hbm [shape: f32[2,2,16,16], index: 6, kind: output, shape index: {}]  }
   0x1   :  { %13 = vsyncpa [#allocation5 + $0x1], 0  ;;  %s1578_s21 = smov 0   ;;  %s1580_s22 = smov 0  }
   0x2   :  { %s1582_s23 = smov 0   ;;  %s1584_s24 = smov 0  }
   0x3   :  { %s1586_s25 = smov 0   ;;  %s1588_s26 = smov 0  }
   0x4 LB: > { %s1276_s27 = sadd.s32 4294967295, %s1538_s26   ;;  %s1277_s28 = sadd.s32 4294967294, %s1538_s26   ;;  %s1538_s26 = sphi %s1588_s26, %s19_s26   ;;  %s1534_s25 = sphi %s1586_s25, %s2061_s25   ;;  %s1530_s24 = sphi %s1584_s24, %s2060_s24   ;;  %s1526_s23 = sphi %s1582_s23, %s2059_s23   ;;  %s1522_s22 = sphi %s1580_s22, %s2058_s22   ;;  %s1518_s21 = sphi %s1578_s21, %s2057_s21  }
   0x5   : > { %s31_s29 = sadd.s32 1, %s1534_s25  ;;  %s184_s30 = sadd.s32 1, %s1526_s23 }
   0x6   : > { %p33_p0 = scmp.ge.s32.totalorder %s31_s29, 2  ;;  %p194_p1 = scmp.ne.s32.totalorder %s1526_s23, %s1522_s22 }
   0x7   : > { %p195_p2 = scmp.eq.s32.totalorder %s1276_s27, 1  ;;  %p200_p3 = scmp.ne.s32.totalorder %s1522_s22, %s1518_s21 }
   0x8   : > { %s2063_s29 = smov (%p33_p0, %s31_s29), 0  ;;  %p201_p5 = scmp.eq.s32.totalorder %s1277_s28, 1 }
   0x9   : > { %p1618_p4 = por %p195_p2, %p194_p1  ;;  %s181_s8 = ssub.s32 %s1534_s25, %s2063_s29 }
   0xa   : > { %p1283_p6 = scmp.ge.s32.totalorder %s1538_s26, 1  ;;  %p182_p7 = scmp.eq.s32.totalorder %s181_s8, 0 }
   0xb   : > { %p1625_p8 = por %p201_p5, %p200_p3  ;;  %p260_p9 = scmp.lt.s32.totalorder %s1538_s26, 3 }
   0xc   : > { %s1631_s10 = scalar_select %p182_p7, %s1526_s23, %s184_s30  }
   0xd   : > { %p261_p10 = pnand %p1283_p6, %p260_p9 }
   0xe   : > { %p305_p11 = scmp.lt.s32.totalorder (!%p261_p10), %s1530_s24, 1  ;;  %s302_s28 = sand.u32 (!%p261_p10), 1, %s1522_s22  }
   0xf   : > { %264 = sbr.rel (%p261_p10) target bundleno = 717 (0x2cd), region = 44  ;;  %s1284_s30 = sshll.u32 (!%p261_p10), %s302_s28, 5 }
  0x10   : > { %s304_s11 = scalar_lea.vmem (!%p261_p10), [#allocation4], %s1284_s30 }
  0x11   : > { %s1158_s15 = sshll.u32 (!%p261_p10), %s304_s11, 4  ;;  %s1159_s15 = int_to_ptr.vmem [resolvable:$true] %s1158_s15 }
  0x14   : > { %v338_v0 = vld [vmem:[%s2049_s1 + $0x8] sm:$0xff]  ;;  %v337_v1 = vld [vmem:[%s2049_s1] sm:$0xff]  ;;  %v1290_v4 = vld [vmem:[%s2049_s1 + $0x18] sm:$0xff]  ;;  %s306_s27 = scalar_select %p305_p11, %s1530_s24, 1  ;;  %vm347_vm0 = vcmask 130048   ;;  %vm441_vm1 = vcmask 523264  }
  0x15   : > { %v1292_v2 = vld [vmem:[%s2049_s1 + $0x28] sm:$0xff]  ;;  %1400 = vmatpush.msra.mxu1 %v338_v0  ;;  %v1291_v3 = vld [vmem:[%s2049_s1 + $0x20] sm:$0xff]  ;;  %368 = vmatpush.msra.mxu0 %v338_v0  ;;  %v1289_v5 = vld [vmem:[%s2049_s1 + $0x10] sm:$0xff] }
  0x16   : > { %426 = vmatpush.msra.mxu2 %v1292_v2  ;;  %s1398_s8 = sshll.u32 %s306_s27, 5  ;;  %v456_v27 = vld [vmem:[%s2050_s2] sm:$0xff]  ;;  %v457_v35 = vld [vmem:[%s2050_s2 + $0x8] sm:$0xff]  ;;  %v458_v39 = vld [vmem:[%s2050_s2 + $0x10] sm:$0xff]  ;;  %s1480_s27 = scalar_lea.hbm %s2054_s6, 64 }
  0x17   : > { %1401 = vmatpush.msra.mxu1 %v337_v1  ;;  %369 = vmatpush.msra.mxu0 %v337_v1  ;;  %s309_s13 = scalar_lea.vmem %s2048_s0, %s1398_s8  ;;  %v1299_v30 = vld [vmem:[%s2050_s2 + $0x40] sm:$0xff]  ;;  %v1300_v36 = vld [vmem:[%s2050_s2 + $0x48] sm:$0xff]  ;;  %v1301_v40 = vld [vmem:[%s2050_s2 + $0x50] sm:$0xff]  ;;  %s1399_s8 = sshll.u32 %s1530_s24, 5 }
  0x18   : > { %427 = vmatpush.msra.mxu2 %v1291_v3  ;;  %v333_v6 = vld [vmem:[%s309_s13 + $0x8] sm:$0xff]  ;;  %v332_v7 = vld [vmem:[%s309_s13] sm:$0xff]  ;;  %v1287_v8 = vld [vmem:[%s309_s13 + $0x10] sm:$0xff]  ;;  %s1157_s14 = scalar_lea.hbm %s2054_s6, %s1399_s8  ;;  %s1146_s24 = scalar_lea.sflag [#allocation5], %s302_s28 }
  0x19   : > { %397 = vmatpush.msrb.mxu1 %v1290_v4  ;;  %1293 = vmatmul.msk.f32.vlgmr.msra.gmra.mxu0 %vm347_vm0, %v332_v7  ;;  %v345_v9 = vadd.f32 %v1287_v8, %v332_v7  ;;  %v1288_v10 = vld [vmem:[%s309_s13 + $0x18] sm:$0xff]  ;;  %v1307_v33 = vld [vmem:[%s2050_s2 + $0x80] sm:$0xff]  ;;  %v1308_v38 = vld [vmem:[%s2050_s2 + $0x88] sm:$0xff]  ;;  %s1160_s16 = sshll.u32 %s1157_s14, 4  ;;  %s1161_s16 = int_to_ptr.hbm [resolvable:$true] %s1160_s16 }
  0x1a   : > { %1294 = vmatmul.msk.f32.vlgmr.msra.gmra.mxu1 %vm347_vm0, %v333_v6  ;;  %v346_v11 = vadd.f32 %v1288_v10, %v333_v6  ;;  %v775_v37 = vld [vmem:[%s2052_s4] sm:$0xff]  ;;  %v776_v41 = vld [vmem:[%s2052_s4 + $0x8] sm:$0xff]  ;;  %v1309_v42 = vld [vmem:[%s2050_s2 + $0x90] sm:$0xff]  ;;  %s1474_s17 = sshra.s32 %s1161_s16, 4  ;;  %s1475_s17 = int_to_ptr.hbm [resolvable:$true] %s1474_s17 }
  0x1b   : > { %398 = vmatpush.msrb.mxu1 %v1289_v5  ;;  %1297 = vmatmul.msk.f32.vlgmr.msra.gmra.mxu2 %vm347_vm0, %v345_v9  ;;  %v459_v43 = vld [vmem:[%s2050_s2 + $0x18] sm:$0xff]  ;;  %v1347_v45 = vld [vmem:[%s2052_s4 + $0x40] sm:$0xff]  ;;  %v777_v46 = vld [vmem:[%s2052_s4 + $0x10] sm:$0xff]  ;;  %s1476_s18 = scalar_lea.hbm %s1475_s17, 32  ;;  %p1481_p1 = scmp.lt.s32.totalorder %s1475_s17, %s2054_s6 }
  0x1c   : > { %809 = vxpose.xlu0.b32.start [1/8] (short) (narrow) %v775_v37, 16  ;;  %v1302_v44 = vld [vmem:[%s2050_s2 + $0x58] sm:$0xff]  ;;  %871 = vxpose.xlu1.b32.start [1/8] (short) (narrow) %v1347_v45, 16  ;;  %v460_v48 = vld [vmem:[%s2050_s2 + $0x20] sm:$0xff]  ;;  %v1348_v49 = vld [vmem:[%s2052_s4 + $0x48] sm:$0xff]  ;;  %p1477_p12 = scmp.ne.s32.totalorder %s1475_s17, %s1476_s18  ;;  %p1482_p2 = scmp.lt.s32.totalorder %s1480_s27, %s1476_s18 }
  0x1d   : > { %v1310_v47 = vld [vmem:[%s2050_s2 + $0x98] sm:$0xff]  ;;  %v1355_v51 = vld [vmem:[%s2052_s4 + $0x80] sm:$0xff]  ;;  %v461_v54 = vld [vmem:[%s2050_s2 + $0x28] sm:$0xff] }
  0x1e   : > { %v778_v50 = vld [vmem:[%s2052_s4 + $0x18] sm:$0xff]  ;;  %v1303_v52 = vld [vmem:[%s2050_s2 + $0x60] sm:$0xff]  ;;  %932 = vxpose.xlu2.b32.start [1/8] (short) (narrow) %v1355_v51, 16  ;;  %v1356_v55 = vld [vmem:[%s2052_s4 + $0x88] sm:$0xff]  ;;  %p1478_p13 = pnand %p1477_p12, %p1618_p4  ;;  %p1483_p3 = por %p1482_p2, %p1481_p1 }
  0x1f   : > { %v1311_v53 = vld [vmem:[%s2050_s2 + $0xa0] sm:$0xff]  ;;  %v1349_v56 = vld [vmem:[%s2052_s4 + $0x50] sm:$0xff]  ;;  %v1304_v58 = vld [vmem:[%s2050_s2 + $0x68] sm:$0xff] }
  0x20   : > { %v779_v57 = vld [vmem:[%s2052_s4 + $0x20] sm:$0xff]  ;;  %v1312_v59 = vld [vmem:[%s2050_s2 + $0xa8] sm:$0xff]  ;;  %v462_v60 = vld [vmem:[%s2050_s2 + $0x30] sm:$0xff]  ;;  %p1479_p0 = pneg %p1478_p13 }
  0x21   : > { %v1357_v61 = vld [vmem:[%s2052_s4 + $0x90] sm:$0xff]  ;;  %v1350_v62 = vld [vmem:[%s2052_s4 + $0x58] sm:$0xff]  ;;  %v780_v63 = vld [vmem:[%s2052_s4 + $0x28] sm:$0xff] }
  0x22   : > { %1295 = vmatmul.msk.f32.vlgmr.msrb.gmra.mxu1 %vm347_vm0, %v1287_v8  ;;  %v1305_v0 = vld [vmem:[%s2050_s2 + $0x70] sm:$0xff]  ;;  %v463_v2 = vld [vmem:[%s2050_s2 + $0x38] sm:$0xff]  ;;  %v1351_v4 = vld [vmem:[%s2052_s4 + $0x60] sm:$0xff]  ;;  %p1484_p5 = pnand %p1483_p3, %p1479_p0 }
  0x23   : > { %1298 = vmatmul.msk.f32.gmra.mxu2 %vm347_vm0, %v346_v11  ;;  %v1313_v1 = vld [vmem:[%s2050_s2 + $0xb0] sm:$0xff]  ;;  %v1358_v3 = vld [vmem:[%s2052_s4 + $0x98] sm:$0xff]  ;;  %v1359_v8 = vld [vmem:[%s2052_s4 + $0xa0] sm:$0xff] }
  0x24   : > { %810 = vxpose.xlu0.b32.cont [2/8] (short) (narrow) %v776_v41, 16  ;;  %872 = vxpose.xlu1.b32.cont [2/8] (short) (narrow) %v1348_v49, 16  ;;  %v781_v5 = vld [vmem:[%s2052_s4 + $0x30] sm:$0xff]  ;;  %v1306_v6 = vld [vmem:[%s2050_s2 + $0x78] sm:$0xff]  ;;  %v1352_v9 = vld [vmem:[%s2052_s4 + $0x68] sm:$0xff] }
  0x25   : > { %v1314_v7 = vld [vmem:[%s2050_s2 + $0xb8] sm:$0xff]  ;;  %v1360_v11 = vld [vmem:[%s2052_s4 + $0xa8] sm:$0xff] }
  0x26   : > { %933 = vxpose.xlu2.b32.cont [2/8] (short) (narrow) %v1356_v55, 16 }
  0x2a   : > { %1296 = vmatmul.msk.f32.gmra.mxu1 %vm347_vm0, %v1288_v10  ;;  %v782_v10 = vld [vmem:[%s2052_s4 + $0x38] sm:$0xff] }
  0x2c   : > { %811 = vxpose.xlu0.b32.cont [3/8] (short) (narrow) %v777_v46, 16  ;;  %873 = vxpose.xlu1.b32.cont [3/8] (short) (narrow) %v1349_v56, 16 }
  0x2e   : > { %934 = vxpose.xlu2.b32.cont [3/8] (short) (narrow) %v1357_v61, 16 }
  0x34   : > { %812 = vxpose.xlu0.b32.cont [4/8] (short) (narrow) %v778_v50, 16  ;;  %874 = vxpose.xlu1.b32.cont [4/8] (short) (narrow) %v1350_v62, 16 }
  0x36   : > { %935 = vxpose.xlu2.b32.cont [4/8] (short) (narrow) %v1358_v3, 16  ;;  %v1346_v3 = vld [vmem:[%s2051_s3 + $0x78] sm:$0xff] }
  0x3c   : > { %813 = vxpose.xlu0.b32.cont [5/8] (short) (narrow) %v779_v57, 16  ;;  %875 = vxpose.xlu1.b32.cont [5/8] (short) (narrow) %v1351_v4, 16 }
  0x3e   : > { %936 = vxpose.xlu2.b32.cont [5/8] (short) (narrow) %v1359_v8, 16 }
  0x44   : > { %814 = vxpose.xlu0.b32.cont [6/8] (short) (narrow) %v780_v63, 16  ;;  %876 = vxpose.xlu1.b32.cont [6/8] (short) (narrow) %v1352_v9, 16 }
  0x46   : > { %937 = vxpose.xlu2.b32.cont [6/8] (short) (narrow) %v1360_v11, 16  ;;  %v1344_v11 = vld [vmem:[%s2051_s3 + $0x68] sm:$0xff] }
  0x4c   : > { %815 = vxpose.xlu0.b32.cont [7/8] (short) (narrow) %v781_v5, 16 }
  0x54   : > { %816 = vxpose.xlu0.b32.end [8/8] (short) (narrow) %v782_v10, 16  ;;  %v715_v10 = vld [vmem:[%s2051_s3 + $0x28] sm:$0xff] }
  0x96   : > { %v371_v13 = vpop.f32.mrf.mxu0 }
  0x97   : > { %v374_v12 = vpop.f32.mrf.mxu1 }
  0x9e   : > { %v429_v16 = vpop.f32.mrf.mxu2 }
  0x9f   : > { %v400_v14 = vpop.f32.mrf.mxu1  ;;  %v437_v17 = vsub.f32 %v429_v16, %v371_v13 }
  0xa0   : > { %v435_v15 = vsub.f32 %v371_v13, %v400_v14  ;;  %v1354_v13 = vld [vmem:[%s2052_s4 + $0x78] sm:$0xff] }
  0xa1   : > { %v439_v18 = vsub.f32 %v437_v17, %v400_v14  ;;  %v1361_v14 = vld [vmem:[%s2052_s4 + $0xb0] sm:$0xff] }
  0xa2   : > { %442 = vst.msk [vmem:[#allocation2] sm:$0xff] %vm441_vm1, %v435_v15  ;;  %938 = vxpose.xlu2.b32.cont [7/8] (short) (narrow) %v1361_v14, 16 }
  0xa3   : > { %445 = vst.msk [vmem:[#allocation2 + $0x10] sm:$0xff] %vm441_vm1, %v439_v18  ;;  %v447_v19 = vadd.f32 %v439_v18, %v435_v15  ;;  %v1362_v15 = vld [vmem:[%s2052_s4 + $0xb8] sm:$0xff] }
  0xa5   : > { %450 = vst.msk [vmem:[#allocation2 + $0x20] sm:$0xff] %vm441_vm1, %v447_v19 }
  0xa6   : > { %v432_v22 = vpop.f32.mrf.mxu2 }
  0xa7   : > { %v403_v20 = vpop.f32.mrf.mxu1  ;;  %v438_v23 = vsub.f32 %v432_v22, %v374_v12  ;;  %v1339_v22 = vld [vmem:[%s2051_s3 + $0x40] sm:$0xff] }
  0xa8   : > { %v436_v21 = vsub.f32 %v374_v12, %v403_v20  ;;  %v1353_v12 = vld [vmem:[%s2052_s4 + $0x70] sm:$0xff] }
  0xa9   : > { %v440_v24 = vsub.f32 %v438_v23, %v403_v20  ;;  %v482_v28 = vld [vmem:[#allocation2] sm:$0xff]  ;;  %877 = vxpose.xlu1.b32.cont [7/8] (short) (narrow) %v1353_v12, 16 }
  0xaa   : > { %443 = vst.msk [vmem:[#allocation2 + $0x8] sm:$0xff] %vm441_vm1, %v436_v21  ;;  %v485_v31 = vld [vmem:[#allocation2 + $0x10] sm:$0xff]  ;;  %939 = vxpose.xlu2.b32.end [8/8] (short) (narrow) %v1362_v15, 16 }
  0xab   : > { %446 = vst.msk [vmem:[#allocation2 + $0x18] sm:$0xff] %vm441_vm1, %v440_v24  ;;  %v448_v25 = vadd.f32 %v440_v24, %v436_v21  ;;  %v710_v21 = vld [vmem:[%s2051_s3] sm:$0xff] }
  0xac   : > { %v488_v34 = vld [vmem:[#allocation2 + $0x20] sm:$0xff] }
  0xad   : > { %451 = vst.msk [vmem:[#allocation2 + $0x28] sm:$0xff] %vm441_vm1, %v448_v25 }
  0xb1   : > { %v483_v26 = vld [vmem:[#allocation2 + $0x8] sm:$0xff]  ;;  %878 = vxpose.xlu1.b32.end [8/8] (short) (narrow) %v1354_v13, 16 }
  0xb2   : > { %529 = vmatpush.msra.mxu3 %v483_v26  ;;  %v486_v29 = vld [vmem:[#allocation2 + $0x18] sm:$0xff] }
  0xb3   : > { %594 = vmatpush.msrb.mxu0 %v486_v29 }
  0xb4   : > { %530 = vmatpush.msra.mxu3 %v482_v28  ;;  %v489_v32 = vld [vmem:[#allocation2 + $0x28] sm:$0xff] }
  0xb5   : > { %1315 = vmatmul.msk.f32.vlgmr.msra.gmra.mxu3 %vm347_vm0, %v456_v27  ;;  %595 = vmatpush.msrb.mxu0 %v485_v31 }
  0xb6   : > { %659 = vmatpush.msra.mxu1 %v489_v32  ;;  %1323 = vmatmul.msk.f32.vlgmr.msrb.gmra.mxu0 %vm347_vm0, %v1299_v30 }
  0xb8   : > { %660 = vmatpush.msra.mxu1 %v488_v34 }
  0xb9   : > { %1331 = vmatmul.msk.f32.vlgmr.msra.gmra.mxu1 %vm347_vm0, %v1307_v33 }
  0xbd   : > { %1316 = vmatmul.msk.f32.gmra.mxu3 %vm347_vm0, %v457_v35 }
  0xbe   : > { %1324 = vmatmul.msk.f32.gmra.mxu0 %vm347_vm0, %v1300_v36 }
  0xc1   : > { %1332 = vmatmul.msk.f32.gmra.mxu1 %vm347_vm0, %v1308_v38 }
  0xc5   : > { %1317 = vmatmul.msk.f32.gmra.mxu3 %vm347_vm0, %v458_v39 }
  0xc6   : > { %1325 = vmatmul.msk.f32.gmra.mxu0 %vm347_vm0, %v1301_v40 }
  0xc9   : > { %1333 = vmatmul.msk.f32.gmra.mxu1 %vm347_vm0, %v1309_v42 }
  0xcd   : > { %1318 = vmatmul.msk.f32.gmra.mxu3 %vm347_vm0, %v459_v43 }
  0xce   : > { %1326 = vmatmul.msk.f32.gmra.mxu0 %vm347_vm0, %v1302_v44 }
  0xd1   : > { %1334 = vmatmul.msk.f32.gmra.mxu1 %vm347_vm0, %v1310_v47 }
  0xd5   : > { %1319 = vmatmul.msk.f32.gmra.mxu3 %vm347_vm0, %v460_v48 }
  0xd6   : > { %1327 = vmatmul.msk.f32.gmra.mxu0 %vm347_vm0, %v1303_v52 }
  0xd9   : > { %1335 = vmatmul.msk.f32.gmra.mxu1 %vm347_vm0, %v1311_v53 }
  0xdd   : > { %1320 = vmatmul.msk.f32.gmra.mxu3 %vm347_vm0, %v461_v54 }
  0xde   : > { %1328 = vmatmul.msk.f32.gmra.mxu0 %vm347_vm0, %v1304_v58 }
  0xe1   : > { %1336 = vmatmul.msk.f32.gmra.mxu1 %vm347_vm0, %v1312_v59  ;;  %v717_v59 = vld [vmem:[%s2051_s3 + $0x38] sm:$0xff] }
  0xe5   : > { %1321 = vmatmul.msk.f32.gmra.mxu3 %vm347_vm0, %v462_v60 }
  0xe6   : > { %1329 = vmatmul.msk.f32.gmra.mxu0 %vm347_vm0, %v1305_v0 }
  0xe9   : > { %1337 = vmatmul.msk.f32.gmra.mxu1 %vm347_vm0, %v1313_v1  ;;  %v716_v1 = vld [vmem:[%s2051_s3 + $0x30] sm:$0xff] }
  0xed   : > { %1322 = vmatmul.msk.f32.gmra.mxu3 %vm347_vm0, %v463_v2  ;;  %v1345_v2 = vld [vmem:[%s2051_s3 + $0x70] sm:$0xff] }
  0xee   : > { %1330 = vmatmul.msk.f32.gmra.mxu0 %vm347_vm0, %v1306_v6 }
  0xf1   : > { %1338 = vmatmul.msk.f32.gmra.mxu1 %vm347_vm0, %v1314_v7 }
 0x133   : > { %v597_v16 = vpop.f32.mrf.mxu0 }
 0x136   : > { %v662_v17 = vpop.f32.mrf.mxu1 }
 0x138   : > { %v532_v18 = vpop.f32.mrf.mxu3 }
 0x139   : > { %v694_v19 = vsub.f32 %v662_v17, %v532_v18  ;;  %v686_v20 = vsub.f32 %v532_v18, %v597_v16  ;;  %v714_v17 = vld [vmem:[%s2051_s3 + $0x20] sm:$0xff] }
 0x13a   : > { %v1343_v18 = vld [vmem:[%s2051_s3 + $0x60] sm:$0xff] }
 0x13b   : > { %v702_v23 = vsub.f32 %v694_v19, %v597_v16  ;;  %v751_v24 = vmul.f32 %v1339_v22, %v686_v20  ;;  %v1842_v26 = vpop.f32.mrf.mxu0  ;;  %v727_v27 = vmul.f32 %v710_v21, %v686_v20 }
 0x13d   : > { %v759_v25 = vmul.f32 %v710_v21, %v702_v23  ;;  %v735_v28 = vmul.f32 %v1339_v22, %v702_v23 }
 0x13e   : > { %v665_v29 = vpop.f32.mrf.mxu1 }
 0x13f   : > { %v1844_v30 = vsub.f32 %v727_v27, %v735_v28  ;;  %v1846_v31 = vadd.f32 %v759_v25, %v751_v24  ;;  %v713_v24 = vld [vmem:[%s2051_s3 + $0x18] sm:$0xff] }
 0x140   : > { %v1848_v32 = vpop.f32.mrf.mxu3  ;;  %v1342_v25 = vld [vmem:[%s2051_s3 + $0x58] sm:$0xff] }
 0x141   : > { %v1852_v33 = vadd.f32 %v1846_v31, %v1844_v30  ;;  %v695_v8 = vsub.f32 %v665_v29, %v1848_v32 }
 0x143   : > { %v603_v34 = vpop.f32.mrf.mxu0  ;;  %v703_v23 = vsub.f32 %v695_v8, %v1842_v26 }
 0x146   : > { %v668_v35 = vpop.f32.mrf.mxu1 }
 0x148   : > { %v538_v36 = vpop.f32.mrf.mxu3 }
 0x149   : > { %v696_v63 = vsub.f32 %v668_v35, %v538_v36  ;;  %v688_v27 = vsub.f32 %v538_v36, %v603_v34 }
 0x14b   : > { %v606_v37 = vpop.f32.mrf.mxu0  ;;  %v704_v16 = vsub.f32 %v696_v63, %v603_v34 }
 0x14e   : > { %v671_v38 = vpop.f32.mrf.mxu1 }
 0x150   : > { %v541_v39 = vpop.f32.mrf.mxu3 }
 0x151   : > { %v697_v58 = vsub.f32 %v671_v38, %v541_v39  ;;  %v689_v19 = vsub.f32 %v541_v39, %v606_v37  ;;  %v1341_v38 = vld [vmem:[%s2051_s3 + $0x50] sm:$0xff]  ;;  %v687_v39 = vsub.f32 %v1848_v32, %v1842_v26 }
 0x153   : > { %v609_v40 = vpop.f32.mrf.mxu0  ;;  %v705_v9 = vsub.f32 %v697_v58, %v606_v37  ;;  %v712_v37 = vld [vmem:[%s2051_s3 + $0x10] sm:$0xff]  ;;  %v730_v36 = vmul.f32 %v713_v24, %v689_v19 }
 0x155   : > { %v738_v35 = vmul.f32 %v1342_v25, %v705_v9  ;;  %v762_v63 = vmul.f32 %v713_v24, %v705_v9  ;;  %v1023_v24 = vld [vmem:[%s2053_s5 + $0x20] sm:$0xff] }
 0x156   : > { %v674_v41 = vpop.f32.mrf.mxu1 }
 0x158   : > { %v544_v42 = vpop.f32.mrf.mxu3 }
 0x159   : > { %v698_v53 = vsub.f32 %v674_v41, %v544_v42  ;;  %v690_v12 = vsub.f32 %v544_v42, %v609_v40  ;;  %v711_v41 = vld [vmem:[%s2051_s3 + $0x8] sm:$0xff] }
 0x15a   : > { %v1340_v42 = vld [vmem:[%s2051_s3 + $0x48] sm:$0xff]  ;;  %v728_v26 = vmul.f32 %v711_v41, %v687_v39 }
 0x15b   : > { %v612_v43 = vpop.f32.mrf.mxu0  ;;  %v706_v0 = vsub.f32 %v698_v53, %v609_v40  ;;  %v731_v29 = vmul.f32 %v714_v17, %v690_v12  ;;  %v737_v40 = vmul.f32 %v1341_v38, %v704_v16 }
 0x15d   : > { %v739_v22 = vmul.f32 %v1343_v18, %v706_v0 }
 0x15e   : > { %v677_v44 = vpop.f32.mrf.mxu1 }
 0x15f   : > { %v747_v34 = vsub.f32 %v731_v29, %v739_v22  ;;  %v1025_v22 = vld [vmem:[%s2053_s5 + $0x30] sm:$0xff] }
 0x160   : > { %v547_v45 = vpop.f32.mrf.mxu3  ;;  %v1021_v29 = vld [vmem:[%s2053_s5 + $0x10] sm:$0xff] }
 0x161   : > { %v699_v51 = vsub.f32 %v677_v44, %v547_v45  ;;  %v691_v4 = vsub.f32 %v547_v45, %v612_v43  ;;  %v729_v44 = vmul.f32 %v712_v37, %v688_v27  ;;  %v736_v45 = vmul.f32 %v1340_v42, %v703_v23 }
 0x163   : > { %v615_v46 = vpop.f32.mrf.mxu0  ;;  %v707_v60 = vsub.f32 %v699_v51, %v612_v43  ;;  %v732_v21 = vmul.f32 %v715_v10, %v691_v4  ;;  %v746_v43 = vsub.f32 %v730_v36, %v738_v35  ;;  %v1020_v35 = vld [vmem:[%s2053_s5 + $0x8] sm:$0xff] }
 0x165   : > { %v740_v15 = vmul.f32 %v1344_v11, %v707_v60  ;;  %v764_v51 = vmul.f32 %v715_v10, %v707_v60  ;;  %v760_v60 = vmul.f32 %v711_v41, %v703_v23  ;;  %v1024_v23 = vld [vmem:[%s2053_s5 + $0x28] sm:$0xff]  ;;  %v1379_v41 = vld [vmem:[%s2053_s5 + $0x90] sm:$0xff] }
 0x166   : > { %v680_v47 = vpop.f32.mrf.mxu1 }
 0x167   : > { %v1892_v28 = vsub.f32 %v732_v21, %v740_v15  ;;  %v1540_v21 = vmov 0.0  }
 0x168   : > { %v550_v48 = vpop.f32.mrf.mxu3  ;;  %452 = vst.msk [vmem:[#allocation3] sm:$0xff] %vm441_vm1, %v1540_v21 }
 0x169   : > { %v700_v49 = vsub.f32 %v680_v47, %v550_v48  ;;  %v692_v61 = vsub.f32 %v550_v48, %v615_v46  ;;  %v744_v47 = vsub.f32 %v728_v26, %v736_v45  ;;  %v825_v48 = vpop.trf.xlu0  ;;  %453 = vst.msk [vmem:[#allocation3 + $0x8] sm:$0xff] %vm441_vm1, %v1540_v21  ;;  %v1377_v45 = vld [vmem:[%s2053_s5 + $0x80] sm:$0xff] }
 0x16a   : > { %454 = vst.msk [vmem:[#allocation3 + $0x10] sm:$0xff] %vm441_vm1, %v1540_v21 }
 0x16b   : > { %v618_v50 = vpop.f32.mrf.mxu0  ;;  %v708_v55 = vsub.f32 %v700_v49, %v615_v46  ;;  %v733_v14 = vmul.f32 %v716_v1, %v692_v61  ;;  %v745_v46 = vsub.f32 %v729_v44, %v737_v40  ;;  %455 = vst.msk [vmem:[#allocation3 + $0x18] sm:$0xff] %vm441_vm1, %v1540_v21  ;;  %v1371_v40 = vld [vmem:[%s2053_s5 + $0x50] sm:$0xff]  ;;  %v1378_v44 = vld [vmem:[%s2053_s5 + $0x88] sm:$0xff] }
 0x16d   : > { %v741_v7 = vmul.f32 %v1345_v2, %v708_v55  ;;  %v765_v49 = vmul.f32 %v716_v1, %v708_v55 }
 0x16e   : > { %v683_v52 = vpop.f32.mrf.mxu1 }
 0x16f   : > { %v1882_v20 = vsub.f32 %v733_v14, %v741_v7  ;;  %v887_v7 = vpop.trf.xlu1  ;;  %v999_v26 = vld [vmem:[#allocation3] sm:$0xff] }
 0x170   : > { %v553_v54 = vpop.f32.mrf.mxu3 }
 0x171   : > { %v701_v56 = vsub.f32 %v683_v52, %v553_v54  ;;  %v693_v57 = vsub.f32 %v553_v54, %v618_v50  ;;  %v757_v52 = vmul.f32 %v1345_v2, %v692_v61  ;;  %v763_v54 = vmul.f32 %v714_v17, %v706_v0  ;;  %v1376_v2 = vld [vmem:[%s2053_s5 + $0x78] sm:$0xff]  ;;  %v1375_v17 = vld [vmem:[%s2053_s5 + $0x70] sm:$0xff] }
 0x172   : > { %v753_v61 = vmul.f32 %v1341_v38, %v688_v27  ;;  %1090 = vmatpush.msrb.mxu3 %v1376_v2  ;;  %v1022_v27 = vld [vmem:[%s2053_s5 + $0x18] sm:$0xff] }
 0x173   : > { %v709_v62 = vsub.f32 %v701_v56, %v618_v50  ;;  %v734_v5 = vmul.f32 %v717_v59, %v693_v57  ;;  %v758_v50 = vmul.f32 %v1346_v3, %v693_v57  ;;  %v756_v56 = vmul.f32 %v1344_v11, %v691_v4  ;;  %v826_v57 = vpop.trf.xlu0  ;;  %v1372_v38 = vld [vmem:[%s2053_s5 + $0x58] sm:$0xff] }
 0x174   : > { %v773_v58 = vadd.f32 %v765_v49, %v757_v52  ;;  %1091 = vmatpush.msrb.mxu3 %v1375_v17  ;;  %v1000_v49 = vld [vmem:[#allocation3 + $0x8] sm:$0xff] }
 0x175   : > { %v742_v6 = vmul.f32 %v1346_v3, %v709_v62  ;;  %v766_v32 = vmul.f32 %v717_v59, %v709_v62  ;;  %v772_v59 = vadd.f32 %v764_v51, %v756_v56  ;;  %v761_v62 = vmul.f32 %v712_v37, %v704_v16  ;;  %v1384_v3 = vld [vmem:[%s2053_s5 + $0xb8] sm:$0xff]  ;;  %v1019_v37 = vld [vmem:[%s2053_s5] sm:$0xff] }
 0x176   : > { %1119 = vmatpush.msra.mxu0 %v1384_v3  ;;  %v807_v9 = vadd.f32 %v773_v58, %v1882_v20  ;;  %v1006_v56 = vld [vmem:[#allocation3 + $0x10] sm:$0xff] }
 0x177   : > { %v1873_v13 = vsub.f32 %v734_v5, %v742_v6  ;;  %v774_v53 = vadd.f32 %v766_v32, %v758_v50  ;;  %v755_v5 = vmul.f32 %v1343_v18, %v690_v12  ;;  %v754_v6 = vmul.f32 %v1342_v25, %v689_v19  ;;  %v888_v14 = vpop.trf.xlu1  ;;  %v1383_v18 = vld [vmem:[%s2053_s5 + $0xb0] sm:$0xff]  ;;  %v1374_v19 = vld [vmem:[%s2053_s5 + $0x68] sm:$0xff]  ;;  %v1373_v25 = vld [vmem:[%s2053_s5 + $0x60] sm:$0xff] }
 0x178   : > { %v769_v0 = vadd.f32 %v761_v62, %v753_v61  ;;  %v806_v10 = vadd.f32 %v772_v59, %v1892_v28  ;;  %1120 = vmatpush.msra.mxu0 %v1383_v18  ;;  %1092 = vmatpush.msrb.mxu3 %v1374_v19 }
 0x179   : > { %856 = vmatpush.msrb.mxu2 %v1873_v13  ;;  %v771_v55 = vadd.f32 %v763_v54, %v755_v5  ;;  %v770_v1 = vadd.f32 %v762_v63, %v754_v6  ;;  %v808_v8 = vadd.f32 %v774_v53, %v1873_v13  ;;  %v1007_v6 = vld [vmem:[#allocation3 + $0x18] sm:$0xff] }
 0x17a   : > { %v803_v15 = vadd.f32 %v769_v0, %v745_v46  ;;  %1093 = vmatpush.msrb.mxu3 %v1373_v25 }
 0x17b   : > { %857 = vmatpush.msrb.mxu2 %v1882_v20  ;;  %v805_v11 = vadd.f32 %v771_v55, %v747_v34  ;;  %v804_v12 = vadd.f32 %v770_v1, %v746_v43  ;;  %v1382_v20 = vld [vmem:[%s2053_s5 + $0xa8] sm:$0xff] }
 0x17c   : > { %1121 = vmatpush.msra.mxu0 %v1382_v20  ;;  %1094 = vmatpush.msrb.mxu3 %v1372_v38 }
 0x17d   : > { %858 = vmatpush.msrb.mxu2 %v1892_v28  ;;  %v1381_v28 = vld [vmem:[%s2053_s5 + $0xa0] sm:$0xff] }
 0x17e   : > { %1122 = vmatpush.msra.mxu0 %v1381_v28  ;;  %1095 = vmatpush.msrb.mxu3 %v1371_v40 }
 0x17f   : > { %859 = vmatpush.msrb.mxu2 %v747_v34 }
 0x181   : > { %860 = vmatpush.msrb.mxu2 %v746_v43  ;;  %v1369_v43 = vld [vmem:[%s2053_s5 + $0x40] sm:$0xff] }
 0x183   : > { %861 = vmatpush.msrb.mxu2 %v745_v46 }
 0x185   : > { %862 = vmatpush.msrb.mxu2 %v744_v47 }
 0x187   : > { %863 = vmatpush.msrb.mxu2 %v1844_v30  ;;  %v752_v30 = vmul.f32 %v1340_v42, %v687_v39  ;;  %v1380_v39 = vld [vmem:[%s2053_s5 + $0x98] sm:$0xff]  ;;  %v1370_v42 = vld [vmem:[%s2053_s5 + $0x48] sm:$0xff] }
 0x188   : > { %1363 = vmatmul.msk.f32.vlgmr.msrb.gmra.mxu2 %vm441_vm1, %v825_v48  ;;  %1123 = vmatpush.msra.mxu0 %v1380_v39 }
 0x189   : > { %917 = vmatpush.msra.mxu2 %v774_v53  ;;  %v768_v4 = vadd.f32 %v760_v60, %v752_v30  ;;  %1096 = vmatpush.msrb.mxu3 %v1370_v42 }
 0x18a   : > { %1124 = vmatpush.msra.mxu0 %v1379_v41 }
 0x18b   : > { %918 = vmatpush.msra.mxu2 %v773_v58  ;;  %v802_v13 = vadd.f32 %v768_v4, %v744_v47  ;;  %1097 = vmatpush.msrb.mxu3 %v1369_v43 }
 0x18c   : > { %1125 = vmatpush.msra.mxu0 %v1378_v44 }
 0x18d   : > { %919 = vmatpush.msra.mxu2 %v772_v59 }
 0x18e   : > { %1126 = vmatpush.msra.mxu0 %v1377_v45 }
 0x18f   : > { %920 = vmatpush.msra.mxu2 %v771_v55 }
 0x190   : > { %1364 = vmatmul.msk.f32.gmra.mxu2 %vm441_vm1, %v826_v57 }
 0x191   : > { %921 = vmatpush.msra.mxu2 %v770_v1 }
 0x193   : > { %922 = vmatpush.msra.mxu2 %v769_v0 }
 0x195   : > { %923 = vmatpush.msra.mxu2 %v768_v4 }
 0x197   : > { %924 = vmatpush.msra.mxu2 %v1846_v31  ;;  %v948_v31 = vpop.trf.xlu2 }
 0x198   : > { %1365 = vmatmul.msk.f32.vlgmr.msra.gmra.mxu2 %vm441_vm1, %v887_v7 }
 0x199   : > { %978 = vmatpush.msrb.mxu2 %v808_v8 }
 0x19b   : > { %979 = vmatpush.msrb.mxu2 %v807_v9 }
 0x19d   : > { %980 = vmatpush.msrb.mxu2 %v806_v10 }
 0x19f   : > { %981 = vmatpush.msrb.mxu2 %v805_v11  ;;  %v949_v16 = vpop.trf.xlu2 }
 0x1a0   : > { %1366 = vmatmul.msk.f32.gmra.mxu2 %vm441_vm1, %v888_v14 }
 0x1a1   : > { %982 = vmatpush.msrb.mxu2 %v804_v12 }
 0x1a3   : > { %983 = vmatpush.msrb.mxu2 %v803_v15 }
 0x1a5   : > { %984 = vmatpush.msrb.mxu2 %v802_v13 }
 0x1a7   : > { %985 = vmatpush.msrb.mxu2 %v1852_v33  ;;  %v1026_v33 = vld [vmem:[%s2053_s5 + $0x38] sm:$0xff] }
 0x1a8   : > { %1367 = vmatmul.msk.f32.vlgmr.msrb.gmra.mxu2 %vm441_vm1, %v948_v31 }
 0x1a9   : > { %1061 = vmatpush.msra.mxu2 %v1026_v33 }
 0x1ab   : > { %1062 = vmatpush.msra.mxu2 %v1025_v22 }
 0x1ad   : > { %1063 = vmatpush.msra.mxu2 %v1024_v23 }
 0x1af   : > { %1064 = vmatpush.msra.mxu2 %v1023_v24 }
 0x1b0   : > { %1368 = vmatmul.msk.f32.gmra.mxu2 %vm441_vm1, %v949_v16 }
 0x1b1   : > { %1065 = vmatpush.msra.mxu2 %v1022_v27 }
 0x1b3   : > { %1066 = vmatpush.msra.mxu2 %v1021_v29 }
 0x1b5   : > { %1067 = vmatpush.msra.mxu2 %v1020_v35 }
 0x1b7   : > { %1068 = vmatpush.msra.mxu2 %v1019_v37 }
 0x20b   : > { %v865_v34 = vpop.f32.mrf.mxu2 }
 0x213   : > { %v868_v36 = vpop.f32.mrf.mxu2 }
 0x21b   : > { %v926_v46 = vpop.f32.mrf.mxu2 }
 0x21c   : > { %v993_v32 = vsub.f32 %v865_v34, %v926_v46 }
 0x21e   : > { %v1001_v47 = vadd.f32 %v999_v26, %v993_v32 }
 0x220   : > { %1003 = vst.msk [vmem:[#allocation3] sm:$0xff] %vm441_vm1, %v1001_v47 }
 0x223   : > { %v929_v48 = vpop.f32.mrf.mxu2 }
 0x224   : > { %v994_v50 = vsub.f32 %v868_v36, %v929_v48 }
 0x226   : > { %v1002_v51 = vadd.f32 %v1000_v49, %v994_v50 }
 0x227   : > { %v1015_v52 = vld [vmem:[#allocation3] sm:$0xff] }
 0x228   : > { %1004 = vst.msk [vmem:[#allocation3 + $0x8] sm:$0xff] %vm441_vm1, %v1002_v51  ;;  %1385 = vmatmul.msk.f32.vlgmr.msra.gmra.mxu2 %vm441_vm1, %v1015_v52 }
 0x22b   : > { %v987_v53 = vpop.f32.mrf.mxu2 }
 0x22c   : > { %v995_v54 = vsub.f32 %v987_v53, %v865_v34 }
 0x22e   : > { %v997_v58 = vsub.f32 %v995_v54, %v926_v46 }
 0x22f   : > { %v1016_v63 = vld [vmem:[#allocation3 + $0x8] sm:$0xff] }
 0x230   : > { %v1008_v5 = vadd.f32 %v1006_v56, %v997_v58  ;;  %1386 = vmatmul.msk.f32.gmra.mxu2 %vm441_vm1, %v1016_v63 }
 0x232   : > { %1010 = vst.msk [vmem:[#allocation3 + $0x10] sm:$0xff] %vm441_vm1, %v1008_v5 }
 0x233   : > { %v990_v59 = vpop.f32.mrf.mxu2 }
 0x234   : > { %v996_v62 = vsub.f32 %v990_v59, %v868_v36 }
 0x236   : > { %v998_v55 = vsub.f32 %v996_v62, %v929_v48 }
 0x238   : > { %v1009_v57 = vadd.f32 %v1007_v6, %v998_v55 }
 0x239   : > { %v1017_v60 = vld [vmem:[#allocation3 + $0x10] sm:$0xff] }
 0x23a   : > { %1011 = vst.msk [vmem:[#allocation3 + $0x18] sm:$0xff] %vm441_vm1, %v1009_v57  ;;  %v1045_v61 = vadd.f32 %v1017_v60, %v1015_v52  ;;  %1387 = vmatmul.msk.f32.vlgmr.msrb.gmra.mxu3 %vm441_vm1, %v1017_v60 }
 0x23c   : > { %1389 = vmatmul.msk.f32.vlgmr.msra.gmra.mxu0 %vm441_vm1, %v1045_v61 }
 0x241   : > { %v1018_v1 = vld [vmem:[#allocation3 + $0x18] sm:$0xff] }
 0x242   : > { %v1046_v30 = vadd.f32 %v1018_v1, %v1016_v63  ;;  %1388 = vmatmul.msk.f32.gmra.mxu3 %vm441_vm1, %v1018_v1 }
 0x244   : > { %1390 = vmatmul.msk.f32.gmra.mxu0 %vm441_vm1, %v1046_v30 }
 0x2ab   : > { %v1070_v0 = vpop.f32.mrf.mxu2 }
 0x2b3   : > { %v1073_v10 = vpop.f32.mrf.mxu2 }
 0x2b9   : > { %v1128_v2 = vpop.f32.mrf.mxu0 }
 0x2ba   : > { %v1136_v3 = vsub.f32 %v1128_v2, %v1070_v0 }
 0x2bd   : > { %v1099_v4 = vpop.f32.mrf.mxu3 }
 0x2be   : > { %v1134_v7 = vsub.f32 %v1070_v0, %v1099_v4  ;;  %v1138_v8 = vsub.f32 %v1136_v3, %v1099_v4 }
 0x2c0   : > { %1140 = vst.msk [vmem:[%s304_s11] sm:$0xff] %vm347_vm0, %v1134_v7 }
 0x2c1   : > { %1391 = vst.msk [vmem:[%s304_s11 + $0x10] sm:$0xff] %vm347_vm0, %v1138_v8  ;;  %v1131_v9 = vpop.f32.mrf.mxu0 }
 0x2c2   : > { %v1137_v11 = vsub.f32 %v1131_v9, %v1073_v10 }
 0x2c5   : > { %v1102_v12 = vpop.f32.mrf.mxu3 }
 0x2c6   : > { %v1135_v14 = vsub.f32 %v1073_v10, %v1102_v12  ;;  %v1139_v15 = vsub.f32 %v1137_v11, %v1102_v12 }
 0x2c8   : > { %1141 = vst.msk [vmem:[%s304_s11 + $0x8] sm:$0xff] %vm347_vm0, %v1135_v14 }
 0x2c9   : > { %1392 = vst.msk [vmem:[%s304_s11 + $0x18] sm:$0xff] %vm347_vm0, %v1139_v15 }
 0x2ca   : > { %1487 = shalt.err (!%p1484_p5)
}
 0x2cb   : > { %s1541_s28 = smov 128   ;;  %s1542_s11 = smov 8  }
 0x2cc   : > { %1402 = dma.vmem_to_hbm [thread:$0]  (%p1618_p4), %s1159_s15, 512, %s1161_s16, %s1146_s24, %s1541_s28, %s1541_s28, %s1542_s11  }
 0x2cd PF: > { %p1408_p6 = scmp.ge.s32.totalorder %s1538_s26, 2  ;;  %s1175_s12 = sand.u32 1, %s1518_s21  }
 0x2ce   : > { %s1176_s13 = scalar_lea.sflag [#allocation5], %s1175_s12 }
 0x2cf   : > { %p1405_p7 = pnand %p1408_p6, %p1625_p8 }
 0x2d1   : > { %p1406_p9 = pneg %p1405_p7 }
 0x2d3   : > { %1513 = dma.done.wait (%p1406_p9), %s1176_s13, 512  }
 0x2d4   : > { %1515 = vsyncadd (%p1406_p9), %s1176_s13, 4294966784  ;;  %s19_s26 = sadd.s32 1, %s1538_s26   ;;  %s2057_s21 = smov %s1522_s22 }
 0x2d5   : > { %p16_p10 = scmp.ge.s32.totalorder %s19_s26, 4   ;;  %s2058_s22 = smov %s1526_s23 }
 0x2d6   : > { %s2059_s23 = smov %s1631_s10  ;;  %s2060_s24 = smov %s1534_s25 }
 0x2d7   : > { %s2061_s25 = smov %s2063_s29  ;;  %18 = sbr.rel (!%p16_p10) target bundleno = 4 (0x4), region = 112 }
 0x2dc   :  { %1182 = vsyncpa [#allocation5], 1 }
 0x2dd   :  { %1184 = vsyncpa [#allocation5 + $0x1], 1 }

</bundles_post_ra>
